<compile_context>
chip_gen: v6e
topology: v6e:2x2x1
jax: 0.10.0
libtpu: 0.0.40
codegen_flags: <defaults>
</compile_context>

<pallas_src>
import functools

import jax
import jax.numpy as jnp
from jax.experimental import pallas as pl
from jax.experimental.pallas import tpu as pltpu


# ----------------------------------------------------------------------------
# Pallas kernel: fused (activation -> MXU GEMM -> bias)
# ----------------------------------------------------------------------------
def _gemm_bias_act_kernel(p_ref, w_ref, b_ref, o_ref, *, negative_slope):
    """o = W @ act(P) + b.

    p_ref: (K, TM)    im2col patch tile (lane axis = output positions)
    w_ref: (Cout, K)  reshaped conv weight (resident across the grid)
    b_ref: (Cout, 1)  bias column
    o_ref: (Cout, TM) output tile
    negative_slope: 0.2 -> LeakyReLU(0.2), 0.0 -> ReLU (fused pre-activation).
    """
    p = p_ref[...]
    p = jnp.where(p > 0, p, negative_slope * p)
    acc = jnp.dot(w_ref[...], p, preferred_element_type=jnp.float32)
    o_ref[...] = acc + b_ref[...]


def _round_up(x, m):
    return ((x + m - 1) // m) * m


def _pallas_gemm_bias_act(p_t, w_mat, b_col, negative_slope):
    """Compute W @ act(P) + b with a lane-dense Pallas call.

    p_t:   (K, M) float32 patch matrix
    w_mat: (Cout, K) float32
    b_col: (Cout, 1) float32
    returns (Cout, M) float32
    """
    p_t = p_t.astype(jnp.float32)
    w_mat = w_mat.astype(jnp.float32)
    b_col = b_col.astype(jnp.float32)

    K, M = p_t.shape
    c_out = w_mat.shape[0]

    # Lane-dense M: pad to a multiple of 128, tile at up to 512 lanes per step.
    m_pad = _round_up(M, 128)
    tm = min(512, m_pad)
    m_pad = _round_up(m_pad, tm)
    if m_pad != M:
        p_t = jnp.pad(p_t, ((0, 0), (0, m_pad - M)))

    out = pl.pallas_call(
        functools.partial(_gemm_bias_act_kernel, negative_slope=negative_slope),
        out_shape=jax.ShapeDtypeStruct((c_out, m_pad), jnp.float32),
        grid=(m_pad // tm,),
        in_specs=[
            pl.BlockSpec((K, tm), lambda m: (0, m)),        # patch tile
            pl.BlockSpec((c_out, K), lambda m: (0, 0)),     # weights (resident)
            pl.BlockSpec((c_out, 1), lambda m: (0, 0)),     # bias (resident)
        ],
        out_specs=pl.BlockSpec((c_out, tm), lambda m: (0, m)),
        compiler_params=pltpu.CompilerParams(
            dimension_semantics=("parallel",),  # lets v7x split M across 2 TCs
        ),
    )(p_t, w_mat, b_col)
    return out[:, :M]


# ----------------------------------------------------------------------------
# Data-movement helpers (JAX wrapper plumbing, no arithmetic)
# ----------------------------------------------------------------------------
def _conv_down_patches(x, oh, ow):
    """im2col for Conv2d(k=4, s=2, p=1).  x: (N,C,H,W) -> (C*16, N*oh*ow)."""
    n, c, _, _ = x.shape
    xp = jnp.pad(x, ((0, 0), (0, 0), (1, 1), (1, 1)))
    taps = []
    for kh in range(4):
        for kw in range(4):
            taps.append(xp[:, :, kh:kh + 2 * oh:2, kw:kw + 2 * ow:2])
    p = jnp.stack(taps, axis=2)              # (N, C, 16, oh, ow)
    p = p.transpose(1, 2, 0, 3, 4)           # (C, 16, N, oh, ow)
    return p.reshape(c * 16, n * oh * ow)    # K ordered (ci, kh, kw)


def _conv_transpose_patches(y, h_out, w_out):
    """im2col for ConvTranspose2d(k=4, s=2, p=1) realized as zero-insertion
    + stride-1 conv with the flipped kernel.  y: (N,C,oh,ow) (pre-ReLU)."""
    n, c, oh, ow = y.shape
    z = jnp.zeros((n, c, 2 * oh - 1, 2 * ow - 1), y.dtype)
    z = z.at[:, :, ::2, ::2].set(y)                       # stride-2 zero insertion
    zp = jnp.pad(z, ((0, 0), (0, 0), (2, 2), (2, 2)))     # pad = k - 1 - p = 2
    taps = []
    for kh in range(4):
        for kw in range(4):
            taps.append(zp[:, :, kh:kh + h_out, kw:kw + w_out])
    p = jnp.stack(taps, axis=2)
    p = p.transpose(1, 2, 0, 3, 4)
    return p.reshape(c * 16, n * h_out * w_out)


# ----------------------------------------------------------------------------
# Forward pass of the innermost UnetSkipConnectionBlock
# ----------------------------------------------------------------------------
def unet_skip_block_innermost(x, w_down, b_down, w_up, b_up):
    """x: (N, input_nc, H, W)
    w_down: (inner_nc, input_nc, 4, 4), b_down: (inner_nc,)      [Conv2d]
    w_up:   (inner_nc, outer_nc, 4, 4), b_up: (outer_nc,)        [ConvTranspose2d]
    returns (N, input_nc + outer_nc, H, W) = cat([x, model(x)], dim=1)
    """
    n, c_in, h, w = x.shape
    inner_nc = w_down.shape[0]
    outer_nc = w_up.shape[1]
    oh, ow = h // 2, w // 2

    # ---- down: LeakyReLU(0.2) -> Conv2d(k4,s2,p1) (fused in one kernel) ----
    p1 = _conv_down_patches(x, oh, ow)                         # (c_in*16, N*oh*ow)
    w1 = w_down.reshape(inner_nc, c_in * 16)
    y = _pallas_gemm_bias_act(p1, w1, b_down.reshape(inner_nc, 1),
                              negative_slope=0.2)              # (inner_nc, N*oh*ow)
    y = y.reshape(inner_nc, n, oh, ow).transpose(1, 0, 2, 3)   # (N, inner_nc, oh, ow)

    # ---- up: ReLU -> ConvTranspose2d(k4,s2,p1) (fused in one kernel) ----
    p2 = _conv_transpose_patches(y, h, w)                      # (inner_nc*16, N*H*W)
    w2 = jnp.flip(w_up, axis=(2, 3)).transpose(1, 0, 2, 3)     # flip + swap in/out
    w2 = w2.reshape(outer_nc, inner_nc * 16)
    u = _pallas_gemm_bias_act(p2, w2, b_up.reshape(outer_nc, 1),
                              negative_slope=0.0)              # (outer_nc, N*H*W)
    u = u.reshape(outer_nc, n, h, w).transpose(1, 0, 2, 3)     # (N, outer_nc, H, W)

    # ---- skip connection ----
    return jnp.concatenate([x, u], axis=1)


# ----------------------------------------------------------------------------
# Pure-JAX reference (independent implementation via XLA convolutions)
# ----------------------------------------------------------------------------
def _ref_forward(x, w_down, b_down, w_up, b_up):
    lx = jnp.where(x > 0, x, 0.2 * x)                           # LeakyReLU(0.2)
    y = jax.lax.conv_general_dilated(
        lx, w_down, window_strides=(2, 2), padding=((1, 1), (1, 1)),
        dimension_numbers=("NCHW", "OIHW", "NCHW"),
    ) + b_down[None, :, None, None]
    ry = jnp.maximum(y, 0.0)                                    # ReLU
    w_eq = jnp.flip(w_up, axis=(2, 3)).transpose(1, 0, 2, 3)    # (outer, inner, 4, 4)
    u = jax.lax.conv_general_dilated(
        ry, w_eq, window_strides=(1, 1), padding=((2, 2), (2, 2)),
        lhs_dilation=(2, 2),
        dimension_numbers=("NCHW", "OIHW", "NCHW"),
    ) + b_up[None, :, None, None]
    return jnp.concatenate([x, u], axis=1)


if __name__ == "__main__":
    key = jax.random.PRNGKey(0)
    k1, k2, k3, k4, k5 = jax.random.split(key, 5)

    N, input_nc, inner_nc, outer_nc, H, W = 2, 4, 8, 4, 16, 16
    x = jax.random.normal(k1, (N, input_nc, H, W), dtype=jnp.float32)
    w_down = 0.1 * jax.random.normal(k2, (inner_nc, input_nc, 4, 4), dtype=jnp.float32)
    b_down = 0.1 * jax.random.normal(k3, (inner_nc,), dtype=jnp.float32)
    w_up = 0.1 * jax.random.normal(k4, (inner_nc, outer_nc, 4, 4), dtype=jnp.float32)
    b_up = 0.1 * jax.random.normal(k5, (outer_nc,), dtype=jnp.float32)

    out = jax.jit(unet_skip_block_innermost)(x, w_down, b_down, w_up, b_up)
    out = jax.block_until_ready(out)

    ref = _ref_forward(x, w_down, b_down, w_up, b_up)

    assert out.shape == (N, input_nc + outer_nc, H, W), out.shape
    # Tolerance covers MXU default-precision (bf16-pass) rounding differences
    # between the Pallas GEMM path and the XLA conv reference; real bugs give
    # O(0.1-1) discrepancies.
    max_diff = float(jnp.max(jnp.abs(out - ref)))
    assert jnp.allclose(out, ref, atol=1e-2, rtol=1e-2), max_diff

    print("KERNEL_OK")
</pallas_src>

<mosaic_0001>
module attributes {stable_mosaic.version = 11 : i64} {
  func.func @_gemm_bias_act_kernel(%arg0: i32, %arg1: memref<64x128xf32, #tpu.memory_space<vmem>>, %arg2: memref<8x64xf32, #tpu.memory_space<vmem>>, %arg3: memref<8x1xf32, #tpu.memory_space<vmem>>, %arg4: memref<8x128xf32, #tpu.memory_space<vmem>>) attributes {dimension_semantics = [#tpu.dimension_semantics<parallel>], iteration_bounds = array<i64: 1>, scalar_prefetch = 0 : i64, scratch_operands = 0 : i64, tpu.core_type = #tpu.core_type<tc>, window_params = [{transform_indices = @transform_0, window_bounds = array<i64: 64, 128>}, {pipeline_mode = #tpu.pipeline_mode<synchronous>, transform_indices = @transform_1, window_bounds = array<i64: 8, 64>}, {pipeline_mode = #tpu.pipeline_mode<synchronous>, transform_indices = @transform_2, window_bounds = array<i64: 8, 1>}, {transform_indices = @transform_3, window_bounds = array<i64: 8, 128>}]} {
    %c0 = arith.constant 0 : index
    %c0_0 = arith.constant 0 : index
    %0 = vector.load %arg1[%c0, %c0_0] : memref<64x128xf32, #tpu.memory_space<vmem>>, vector<64x128xf32>
    %cst = arith.constant 0.000000e+00 : f32
    %1 = vector.broadcast %cst : f32 to vector<64x128xf32>
    %2 = arith.cmpf ogt, %0, %1 : vector<64x128xf32>
    %cst_1 = arith.constant 2.000000e-01 : f32
    %3 = vector.broadcast %cst_1 : f32 to vector<64x128xf32>
    %4 = arith.mulf %3, %0 : vector<64x128xf32>
    %5 = arith.select %2, %0, %4 : vector<64x128xi1>, vector<64x128xf32>
    %c0_2 = arith.constant 0 : index
    %c0_3 = arith.constant 0 : index
    %6 = vector.load %arg2[%c0_2, %c0_3] : memref<8x64xf32, #tpu.memory_space<vmem>>, vector<8x64xf32>
    %cst_4 = arith.constant dense<0.000000e+00> : vector<8x128xf32>
    %7 = tpu.matmul %6, %5, %cst_4 {dimension_numbers = #tpu.dot_dimension_numbers<[1], [0], [0], [1], [0, 0, 1, 1], [], []>} : vector<8x64xf32>, vector<64x128xf32>, vector<8x128xf32> -> vector<8x128xf32>
    %c0_5 = arith.constant 0 : index
    %c0_6 = arith.constant 0 : index
    %8 = vector.load %arg3[%c0_5, %c0_6] : memref<8x1xf32, #tpu.memory_space<vmem>>, vector<8x1xf32>
    %9 = vector.broadcast %8 : vector<8x1xf32> to vector<8x128xf32>
    %10 = arith.addf %7, %9 : vector<8x128xf32>
    %c0_7 = arith.constant 0 : index
    %c0_8 = arith.constant 0 : index
    %11 = vector.load %arg4[%c0_7, %c0_8] : memref<8x128xf32, #tpu.memory_space<vmem>>, vector<8x128xf32>
    tpu.vector_store %arg4[%c0_7, %c0_8], %10 {strides = array<i32>} : memref<8x128xf32, #tpu.memory_space<vmem>>, vector<8x128xf32>,
    return
  }
  func.func @transform_0(%arg0: i32) -> (i32, i32) {
    %c0_i32 = arith.constant 0 : i32
    %c0_i32_0 = arith.constant 0 : i32
    return %c0_i32, %arg0 : i32, i32
  }
  func.func @transform_1(%arg0: i32) -> (i32, i32) {
    %c0_i32 = arith.constant 0 : i32
    %c0_i32_0 = arith.constant 0 : i32
    %c0_i32_1 = arith.constant 0 : i32
    return %c0_i32, %c0_i32_0 : i32, i32
  }
  func.func @transform_2(%arg0: i32) -> (i32, i32) {
    %c0_i32 = arith.constant 0 : i32
    %c0_i32_0 = arith.constant 0 : i32
    %c0_i32_1 = arith.constant 0 : i32
    return %c0_i32, %c0_i32_0 : i32, i32
  }
  func.func @transform_3(%arg0: i32) -> (i32, i32) {
    %c0_i32 = arith.constant 0 : i32
    %c0_i32_0 = arith.constant 0 : i32
    return %c0_i32, %arg0 : i32, i32
  }
}

module attributes {stable_mosaic.version = 11 : i64} {
  func.func @_gemm_bias_act_kernel(%arg0: i32, %arg1: memref<128x512xf32, #tpu.memory_space<vmem>>, %arg2: memref<4x128xf32, #tpu.memory_space<vmem>>, %arg3: memref<4x1xf32, #tpu.memory_space<vmem>>, %arg4: memref<4x512xf32, #tpu.memory_space<vmem>>) attributes {dimension_semantics = [#tpu.dimension_semantics<parallel>], iteration_bounds = array<i64: 1>, scalar_prefetch = 0 : i64, scratch_operands = 0 : i64, tpu.core_type = #tpu.core_type<tc>, window_params = [{transform_indices = @transform_0, window_bounds = array<i64: 128, 512>}, {pipeline_mode = #tpu.pipeline_mode<synchronous>, transform_indices = @transform_1, window_bounds = array<i64: 4, 128>}, {pipeline_mode = #tpu.pipeline_mode<synchronous>, transform_indices = @transform_2, window_bounds = array<i64: 4, 1>}, {transform_indices = @transform_3, window_bounds = array<i64: 4, 512>}]} {
    %c0 = arith.constant 0 : index
    %c0_0 = arith.constant 0 : index
    %0 = vector.load %arg1[%c0, %c0_0] : memref<128x512xf32, #tpu.memory_space<vmem>>, vector<128x512xf32>
    %cst = arith.constant 0.000000e+00 : f32
    %1 = vector.broadcast %cst : f32 to vector<128x512xf32>
    %2 = arith.cmpf ogt, %0, %1 : vector<128x512xf32>
    %cst_1 = arith.constant 0.000000e+00 : f32
    %3 = vector.broadcast %cst_1 : f32 to vector<128x512xf32>
    %4 = arith.mulf %3, %0 : vector<128x512xf32>
    %5 = arith.select %2, %0, %4 : vector<128x512xi1>, vector<128x512xf32>
    %c0_2 = arith.constant 0 : index
    %c0_3 = arith.constant 0 : index
    %6 = vector.load %arg2[%c0_2, %c0_3] : memref<4x128xf32, #tpu.memory_space<vmem>>, vector<4x128xf32>
    %cst_4 = arith.constant dense<0.000000e+00> : vector<4x512xf32>
    %7 = tpu.matmul %6, %5, %cst_4 {dimension_numbers = #tpu.dot_dimension_numbers<[1], [0], [0], [1], [0, 0, 1, 1], [], []>} : vector<4x128xf32>, vector<128x512xf32>, vector<4x512xf32> -> vector<4x512xf32>
    %c0_5 = arith.constant 0 : index
    %c0_6 = arith.constant 0 : index
    %8 = vector.load %arg3[%c0_5, %c0_6] : memref<4x1xf32, #tpu.memory_space<vmem>>, vector<4x1xf32>
    %9 = vector.broadcast %8 : vector<4x1xf32> to vector<4x512xf32>
    %10 = arith.addf %7, %9 : vector<4x512xf32>
    %c0_7 = arith.constant 0 : index
    %c0_8 = arith.constant 0 : index
    %11 = vector.load %arg4[%c0_7, %c0_8] : memref<4x512xf32, #tpu.memory_space<vmem>>, vector<4x512xf32>
    tpu.vector_store %arg4[%c0_7, %c0_8], %10 {strides = array<i32>} : memref<4x512xf32, #tpu.memory_space<vmem>>, vector<4x512xf32>,
    return
  }
  func.func @transform_0(%arg0: i32) -> (i32, i32) {
    %c0_i32 = arith.constant 0 : i32
    %c0_i32_0 = arith.constant 0 : i32
    return %c0_i32, %arg0 : i32, i32
  }
  func.func @transform_1(%arg0: i32) -> (i32, i32) {
    %c0_i32 = arith.constant 0 : i32
    %c0_i32_0 = arith.constant 0 : i32
    %c0_i32_1 = arith.constant 0 : i32
    return %c0_i32, %c0_i32_0 : i32, i32
  }
  func.func @transform_2(%arg0: i32) -> (i32, i32) {
    %c0_i32 = arith.constant 0 : i32
    %c0_i32_0 = arith.constant 0 : i32
    %c0_i32_1 = arith.constant 0 : i32
    return %c0_i32, %c0_i32_0 : i32, i32
  }
  func.func @transform_3(%arg0: i32) -> (i32, i32) {
    %c0_i32 = arith.constant 0 : i32
    %c0_i32_0 = arith.constant 0 : i32
    return %c0_i32, %arg0 : i32, i32
  }
}

</mosaic_0001>

<bundles_post_ra>
// kernel: unet_skip_block_innermost.2
= control target key start
LH: loop header
LB: loop body
LE: loop exit
PB: predicated region body
PF: predicated region fallthrough
CT: control target
= control target key end

     0   :  { %v165_v0 = vmov 0.0   ;;  %vm166_vm0 = vmmov 0   ;;  %v167_v6 = vmov 0   ;;  %vm53_vm9 = vcmask 523264   ;;  %s221_s0 = inlined_call_operand.vmem [shape: f32[64,128], index: 0, kind: input, shape index: {}]   ;;  %s222_s2 = inlined_call_operand.vmem [shape: f32[8,1], index: 2, kind: input, shape index: {}]   ;;  %s223_s1 = inlined_call_operand.vmem [shape: f32[8,64], index: 1, kind: input, shape index: {}]   ;;  %s224_s3 = inlined_call_operand.vmem [shape: f32[8,128], index: 3, kind: output, shape index: {}]  }
   0x1   :  { %142 = vmatprep.subr.mxu0 %v165_v0  ;;  %v21_v1 = vld [vmem:[%s221_s0 + $0x38] sm:$0xff]  ;;  %v20_v2 = vld [vmem:[%s221_s0 + $0x30] sm:$0xff]  ;;  %v19_v3 = vld [vmem:[%s221_s0 + $0x28] sm:$0xff]  ;;  %158 = vmatprep.mubr.msk.f32.mxu0 %vm166_vm0, %v165_v0 }
   0x2   :  { %vm29_vm1 = vcmp.gt.f32.partialorder %v21_v1, 0.0  ;;  %v37_v4 = vmul.f32 0.2, %v21_v1  ;;  %vm28_vm2 = vcmp.gt.f32.partialorder %v20_v2, 0.0  ;;  %v36_v5 = vmul.f32 0.2, %v20_v2  ;;  %164 = vset.pattern.permute.xlu0 %v167_v6 }
   0x3   :  { %vm27_vm3 = vcmp.gt.f32.partialorder %v19_v3, 0.0  ;;  %v35_v7 = vmul.f32 0.2, %v19_v3  ;;  %v18_v8 = vld [vmem:[%s221_s0 + $0x20] sm:$0xff]  ;;  %v17_v9 = vld [vmem:[%s221_s0 + $0x18] sm:$0xff]  ;;  %v16_v13 = vld [vmem:[%s221_s0 + $0x10] sm:$0xff] }
   0x4   :  { %v45_v10 = vsel %vm29_vm1, %v21_v1, %v37_v4  ;;  %v44_v11 = vsel %vm28_vm2, %v20_v2, %v36_v5  ;;  %v34_v12 = vmul.f32 0.2, %v18_v8  ;;  %vm26_vm4 = vcmp.gt.f32.partialorder %v18_v8, 0.0  ;;  %v47_v14 = vld [vmem:[%s222_s2] sm:$0xff]  ;;  %v15_v17 = vld [vmem:[%s221_s0 + $0x8] sm:$0xff] }
   0x5   :  { %143 = vmatpush3.msra.mxu0 %v45_v10  ;;  %v43_v15 = vsel %vm27_vm3, %v19_v3, %v35_v7  ;;  %v33_v16 = vmul.f32 0.2, %v17_v9  ;;  %50 = vperm.xlu0 %164, %v47_v14   ;;  %vm25_vm5 = vcmp.gt.f32.partialorder %v17_v9, 0.0  ;;  %v32_v19 = vmul.f32 0.2, %v16_v13  ;;  %v14_v20 = vld [vmem:[%s221_s0] sm:$0xff] }
   0x6   :  { %144 = vmatprep.subr.mxu0 %v165_v0  ;;  %v42_v18 = vsel %vm26_vm4, %v18_v8, %v34_v12  ;;  %vm24_vm6 = vcmp.gt.f32.partialorder %v16_v13, 0.0  ;;  %v31_v22 = vmul.f32 0.2, %v15_v17  ;;  %vm23_vm7 = vcmp.gt.f32.partialorder %v15_v17, 0.0  ;;  %v46_v27 = vld [vmem:[%s223_s1] sm:$0xff] }
   0x7   :  { %145 = vmatpush3.msra.mxu0 %v44_v11  ;;  %v41_v21 = vsel %vm25_vm5, %v17_v9, %v33_v16  ;;  %v40_v23 = vsel %vm24_vm6, %v16_v13, %v32_v19  ;;  %v30_v24 = vmul.f32 0.2, %v14_v20  ;;  %vm22_vm8 = vcmp.gt.f32.partialorder %v14_v20, 0.0 }
   0x8   :  { %146 = vmatprep.subr.mxu0 %v165_v0  ;;  %v39_v25 = vsel %vm23_vm7, %v15_v17, %v31_v22 }
   0x9   :  { %147 = vmatpush3.msra.mxu0 %v43_v15  ;;  %v38_v26 = vsel %vm22_vm8, %v14_v20, %v30_v24 }
   0xa   :  { %148 = vmatprep.subr.mxu0 %v165_v0 }
   0xb   :  { %149 = vmatpush3.msra.mxu0 %v42_v18 }
   0xc   :  { %150 = vmatprep.subr.mxu0 %v165_v0 }
   0xd   :  { %151 = vmatpush3.msra.mxu0 %v41_v21 }
   0xe   :  { %152 = vmatprep.subr.mxu0 %v165_v0 }
   0xf   :  { %153 = vmatpush3.msra.mxu0 %v40_v23 }
  0x10   :  { %154 = vmatprep.subr.mxu0 %v165_v0 }
  0x11   :  { %155 = vmatpush3.msra.mxu0 %v39_v25 }
  0x12   :  { %156 = vmatprep.subr.mxu0 %v165_v0 }
  0x13   :  { %157 = vmatpush3.msra.mxu0 %v38_v26 }
  0x14   :  { %159 = vmatmul.mubr.msk.f32.vlgmr.msra.gmra.mxu0 %vm53_vm9, %v46_v27 }
  0x80   :  { %v51_v28 = vpop.permute.xlu0 %50 }
  0xd4   :  { %v123_v29 = vpop.f32.mrf.mxu0 }
  0xd5   :  { %v124_v30 = vadd.f32 %v123_v29, %v51_v28 }
  0xd6   :  { %v160_v31 = vpop.f32.mrf.mxu0 }
  0xd7   :  { %127 = vst [vmem:[%s224_s3] sm:$0xff] %v124_v30 }

// kernel: unet_skip_block_innermost.3
= control target key start
LH: loop header
LB: loop body
LE: loop exit
PB: predicated region body
PF: predicated region fallthrough
CT: control target
= control target key end

     0   :  { %v436_v3 = vmov 0.0   ;;  %v437_v8 = vmov 0   ;;  %s688_s0 = inlined_call_operand.vmem [shape: f32[128,512], index: 0, kind: input, shape index: {}]   ;;  %s689_s2 = inlined_call_operand.vmem [shape: f32[4,1], index: 2, kind: input, shape index: {}]   ;;  %s690_s1 = inlined_call_operand.vmem [shape: f32[4,128], index: 1, kind: input, shape index: {}]   ;;  %s691_s3 = inlined_call_operand.vmem [shape: f32[4,512], index: 3, kind: output, shape index: {}]  }
   0x1   :  { %v75_v0 = vld [vmem:[%s688_s0 + $0x1e8] sm:$0xff]  ;;  %v77_v1 = vld [vmem:[%s688_s0 + $0x1f8] sm:$0xff]  ;;  %v74_v2 = vld [vmem:[%s688_s0 + $0x1e0] sm:$0xff]  ;;  %341 = vmatprep.mubr.f32.mxu0 %v436_v3  ;;  %412 = vmatprep.mubr.f32.mxu1 %v436_v3 }
   0x2   :  { %vm139_vm0 = vcmp.gt.f32.partialorder %v75_v0, 0.0  ;;  %v203_v4 = vmul.f32 0.0, %v75_v0  ;;  %vm141_vm1 = vcmp.gt.f32.partialorder %v77_v1, 0.0  ;;  %v205_v5 = vmul.f32 0.0, %v77_v1  ;;  %v76_v6 = vld [vmem:[%s688_s0 + $0x1f0] sm:$0xff]  ;;  %v71_v7 = vld [vmem:[%s688_s0 + $0x1c8] sm:$0xff]  ;;  %435 = vset.pattern.permute.xlu0 %v437_v8 }
   0x3   :  { %vm138_vm2 = vcmp.gt.f32.partialorder %v74_v2, 0.0  ;;  %v202_v9 = vmul.f32 0.0, %v74_v2  ;;  %vm140_vm3 = vcmp.gt.f32.partialorder %v76_v6, 0.0  ;;  %v204_v10 = vmul.f32 0.0, %v76_v6  ;;  %v73_v11 = vld [vmem:[%s688_s0 + $0x1d8] sm:$0xff]  ;;  %v70_v12 = vld [vmem:[%s688_s0 + $0x1c0] sm:$0xff] }
   0x4   :  { %v267_v13 = vsel %vm139_vm0, %v75_v0, %v203_v4  ;;  %v269_v14 = vsel %vm141_vm1, %v77_v1, %v205_v5  ;;  %vm135_vm4 = vcmp.gt.f32.partialorder %v71_v7, 0.0  ;;  %v199_v15 = vmul.f32 0.0, %v71_v7  ;;  %v72_v16 = vld [vmem:[%s688_s0 + $0x1d0] sm:$0xff]  ;;  %v67_v17 = vld [vmem:[%s688_s0 + $0x1a8] sm:$0xff]  ;;  %v69_v21 = vld [vmem:[%s688_s0 + $0x1b8] sm:$0xff] }
   0x5   :  { %277 = vmatprep.subr.mxu0 %v267_v13  ;;  %348 = vmatprep.subr.mxu1 %v269_v14  ;;  %v266_v18 = vsel %vm138_vm2, %v74_v2, %v202_v9  ;;  %v268_v19 = vsel %vm140_vm3, %v76_v6, %v204_v10  ;;  %vm137_vm5 = vcmp.gt.f32.partialorder %v73_v11, 0.0  ;;  %v201_v20 = vmul.f32 0.0, %v73_v11  ;;  %v66_v22 = vld [vmem:[%s688_s0 + $0x1a0] sm:$0xff]  ;;  %v68_v25 = vld [vmem:[%s688_s0 + $0x1b0] sm:$0xff]  ;;  %v63_v29 = vld [vmem:[%s688_s0 + $0x188] sm:$0xff] }
   0x6   :  { %278 = vmatpush1.msra.mxu0 %v266_v18  ;;  %349 = vmatpush1.msra.mxu1 %v268_v19  ;;  %v263_v23 = vsel %vm135_vm4, %v71_v7, %v199_v15  ;;  %vm134_vm6 = vcmp.gt.f32.partialorder %v70_v12, 0.0  ;;  %v198_v24 = vmul.f32 0.0, %v70_v12  ;;  %vm136_vm7 = vcmp.gt.f32.partialorder %v72_v16, 0.0  ;;  %v65_v32 = vld [vmem:[%s688_s0 + $0x198] sm:$0xff]  ;;  %v62_v33 = vld [vmem:[%s688_s0 + $0x180] sm:$0xff]  ;;  %v64_v37 = vld [vmem:[%s688_s0 + $0x190] sm:$0xff] }
   0x7   :  { %279 = vmatprep.subr.mxu0 %v263_v23  ;;  %v265_v26 = vsel %vm137_vm5, %v73_v11, %v201_v20  ;;  %v200_v27 = vmul.f32 0.0, %v72_v16  ;;  %vm131_vm8 = vcmp.gt.f32.partialorder %v67_v17, 0.0  ;;  %v195_v28 = vmul.f32 0.0, %v67_v17  ;;  %v59_v41 = vld [vmem:[%s688_s0 + $0x168] sm:$0xff]  ;;  %v61_v44 = vld [vmem:[%s688_s0 + $0x178] sm:$0xff]  ;;  %v58_v45 = vld [vmem:[%s688_s0 + $0x160] sm:$0xff] }
   0x8   :  { %350 = vmatprep.subr.mxu1 %v265_v26  ;;  %v262_v30 = vsel %vm134_vm6, %v70_v12, %v198_v24  ;;  %vm133_vm9 = vcmp.gt.f32.partialorder %v69_v21, 0.0  ;;  %v197_v31 = vmul.f32 0.0, %v69_v21  ;;  %vm130_vm10 = vcmp.gt.f32.partialorder %v66_v22, 0.0  ;;  %v60_v49 = vld [vmem:[%s688_s0 + $0x170] sm:$0xff]  ;;  %v55_v53 = vld [vmem:[%s688_s0 + $0x148] sm:$0xff]  ;;  %v57_v56 = vld [vmem:[%s688_s0 + $0x158] sm:$0xff] }
   0x9   :  { %280 = vmatpush1.msra.mxu0 %v262_v30  ;;  %v264_v34 = vsel %vm136_vm7, %v72_v16, %v200_v27  ;;  %v259_v35 = vsel %vm131_vm8, %v67_v17, %v195_v28  ;;  %v194_v36 = vmul.f32 0.0, %v66_v22  ;;  %vm132_vm11 = vcmp.gt.f32.partialorder %v68_v25, 0.0  ;;  %v54_v57 = vld [vmem:[%s688_s0 + $0x140] sm:$0xff]  ;;  %v56_v61 = vld [vmem:[%s688_s0 + $0x150] sm:$0xff]  ;;  %v51_v1 = vld [vmem:[%s688_s0 + $0x128] sm:$0xff] }
   0xa   :  { %351 = vmatpush1.msra.mxu1 %v264_v34  ;;  %281 = vmatprep.subr.mxu0 %v259_v35  ;;  %v261_v38 = vsel %vm133_vm9, %v69_v21, %v197_v31  ;;  %v196_v39 = vmul.f32 0.0, %v68_v25  ;;  %vm127_vm12 = vcmp.gt.f32.partialorder %v63_v29, 0.0  ;;  %v191_v40 = vmul.f32 0.0, %v63_v29  ;;  %v53_v4 = vld [vmem:[%s688_s0 + $0x138] sm:$0xff]  ;;  %v50_v5 = vld [vmem:[%s688_s0 + $0x120] sm:$0xff]  ;;  %v52_v9 = vld [vmem:[%s688_s0 + $0x130] sm:$0xff] }
   0xb   :  { %352 = vmatprep.subr.mxu1 %v261_v38  ;;  %v258_v42 = vsel %vm130_vm10, %v66_v22, %v194_v36  ;;  %vm129_vm13 = vcmp.gt.f32.partialorder %v65_v32, 0.0  ;;  %v193_v43 = vmul.f32 0.0, %v65_v32  ;;  %vm126_vm14 = vcmp.gt.f32.partialorder %v62_v33, 0.0  ;;  %v47_v13 = vld [vmem:[%s688_s0 + $0x108] sm:$0xff]  ;;  %v49_v16 = vld [vmem:[%s688_s0 + $0x118] sm:$0xff]  ;;  %v46_v17 = vld [vmem:[%s688_s0 + $0x100] sm:$0xff] }
   0xc   :  { %282 = vmatpush1.msra.mxu0 %v258_v42  ;;  %v260_v46 = vsel %vm132_vm11, %v68_v25, %v196_v39  ;;  %v255_v47 = vsel %vm127_vm12, %v63_v29, %v191_v40  ;;  %v190_v48 = vmul.f32 0.0, %v62_v33  ;;  %vm128_vm15 = vcmp.gt.f32.partialorder %v64_v37, 0.0  ;;  %v48_v21 = vld [vmem:[%s688_s0 + $0x110] sm:$0xff]  ;;  %v43_v25 = vld [vmem:[%s688_s0 + $0xe8] sm:$0xff]  ;;  %v45_v28 = vld [vmem:[%s688_s0 + $0xf8] sm:$0xff] }
   0xd   :  { %353 = vmatpush1.msra.mxu1 %v260_v46  ;;  %283 = vmatprep.subr.mxu0 %v255_v47  ;;  %v257_v50 = vsel %vm129_vm13, %v65_v32, %v193_v43  ;;  %v192_v51 = vmul.f32 0.0, %v64_v37  ;;  %vm123_vm0 = vcmp.gt.f32.partialorder %v59_v41, 0.0  ;;  %v187_v52 = vmul.f32 0.0, %v59_v41  ;;  %v42_v29 = vld [vmem:[%s688_s0 + $0xe0] sm:$0xff]  ;;  %v39_v38 = vld [vmem:[%s688_s0 + $0xc8] sm:$0xff]  ;;  %v40_v46 = vld [vmem:[%s688_s0 + $0xd0] sm:$0xff] }
   0xe   :  { %354 = vmatprep.subr.mxu1 %v257_v50  ;;  %v254_v54 = vsel %vm126_vm14, %v62_v33, %v190_v48  ;;  %vm125_vm1 = vcmp.gt.f32.partialorder %v61_v44, 0.0  ;;  %v189_v55 = vmul.f32 0.0, %v61_v44  ;;  %vm122_vm2 = vcmp.gt.f32.partialorder %v58_v45, 0.0  ;;  %v44_v33 = vld [vmem:[%s688_s0 + $0xf0] sm:$0xff]  ;;  %v271_v34 = vld [vmem:[%s689_s2] sm:$0xf] }
   0xf   :  { %284 = vmatpush1.msra.mxu0 %v254_v54  ;;  %v256_v58 = vsel %vm128_vm15, %v64_v37, %v192_v51  ;;  %v251_v59 = vsel %vm123_vm0, %v59_v41, %v187_v52  ;;  %v186_v60 = vmul.f32 0.0, %v58_v45  ;;  %vm124_vm3 = vcmp.gt.f32.partialorder %v60_v49, 0.0  ;;  %v41_v41 = vld [vmem:[%s688_s0 + $0xd8] sm:$0xff]  ;;  %v38_v42 = vld [vmem:[%s688_s0 + $0xc0] sm:$0xff]  ;;  %274 = vperm.xlu0 %435, %v271_v34   ;;  %v35_v50 = vld [vmem:[%s688_s0 + $0xa8] sm:$0xff] }
  0x10   :  { %355 = vmatpush1.msra.mxu1 %v256_v58  ;;  %285 = vmatprep.subr.mxu0 %v251_v59  ;;  %v253_v62 = vsel %vm125_vm1, %v61_v44, %v189_v55  ;;  %v188_v63 = vmul.f32 0.0, %v60_v49  ;;  %vm119_vm4 = vcmp.gt.f32.partialorder %v55_v53, 0.0  ;;  %v183_v0 = vmul.f32 0.0, %v55_v53  ;;  %v34_v54 = vld [vmem:[%s688_s0 + $0xa0] sm:$0xff]  ;;  %v36_v58 = vld [vmem:[%s688_s0 + $0xb0] sm:$0xff]  ;;  %v19_v34 = vld [vmem:[%s688_s0 + $0x28] sm:$0xff] }
  0x11   :  { %356 = vmatprep.subr.mxu1 %v253_v62  ;;  %v250_v2 = vsel %vm122_vm2, %v58_v45, %v186_v60  ;;  %vm121_vm5 = vcmp.gt.f32.partialorder %v57_v56, 0.0  ;;  %v185_v3 = vmul.f32 0.0, %v57_v56  ;;  %vm118_vm6 = vcmp.gt.f32.partialorder %v54_v57, 0.0  ;;  %v31_v62 = vld [vmem:[%s688_s0 + $0x88] sm:$0xff] }
  0x12   :  { %286 = vmatpush1.msra.mxu0 %v250_v2  ;;  %v252_v6 = vsel %vm124_vm3, %v60_v49, %v188_v63  ;;  %v247_v7 = vsel %vm119_vm4, %v55_v53, %v183_v0  ;;  %v182_v8 = vmul.f32 0.0, %v54_v57  ;;  %vm120_vm7 = vcmp.gt.f32.partialorder %v56_v61, 0.0  ;;  %v37_v53 = vld [vmem:[%s688_s0 + $0xb8] sm:$0xff]  ;;  %v30_v2 = vld [vmem:[%s688_s0 + $0x80] sm:$0xff] }
  0x13   :  { %357 = vmatpush1.msra.mxu1 %v252_v6  ;;  %287 = vmatprep.subr.mxu0 %v247_v7  ;;  %v249_v10 = vsel %vm121_vm5, %v57_v56, %v185_v3  ;;  %v184_v11 = vmul.f32 0.0, %v56_v61  ;;  %vm115_vm8 = vcmp.gt.f32.partialorder %v51_v1, 0.0  ;;  %v179_v12 = vmul.f32 0.0, %v51_v1  ;;  %v32_v6 = vld [vmem:[%s688_s0 + $0x90] sm:$0xff] }
  0x14   :  { %358 = vmatprep.subr.mxu1 %v249_v10  ;;  %v246_v14 = vsel %vm118_vm6, %v54_v57, %v182_v8  ;;  %vm117_vm9 = vcmp.gt.f32.partialorder %v53_v4, 0.0  ;;  %v181_v15 = vmul.f32 0.0, %v53_v4  ;;  %vm114_vm10 = vcmp.gt.f32.partialorder %v50_v5, 0.0  ;;  %v27_v10 = vld [vmem:[%s688_s0 + $0x68] sm:$0xff] }
  0x15   :  { %288 = vmatpush1.msra.mxu0 %v246_v14  ;;  %v248_v18 = vsel %vm120_vm7, %v56_v61, %v184_v11  ;;  %v243_v19 = vsel %vm115_vm8, %v51_v1, %v179_v12  ;;  %v178_v20 = vmul.f32 0.0, %v50_v5  ;;  %vm116_vm11 = vcmp.gt.f32.partialorder %v52_v9, 0.0  ;;  %v33_v1 = vld [vmem:[%s688_s0 + $0x98] sm:$0xff]  ;;  %v26_v14 = vld [vmem:[%s688_s0 + $0x60] sm:$0xff] }
  0x16   :  { %359 = vmatpush1.msra.mxu1 %v248_v18  ;;  %289 = vmatprep.subr.mxu0 %v243_v19  ;;  %v245_v22 = vsel %vm117_vm9, %v53_v4, %v181_v15  ;;  %v180_v23 = vmul.f32 0.0, %v52_v9  ;;  %vm111_vm12 = vcmp.gt.f32.partialorder %v47_v13, 0.0  ;;  %v175_v24 = vmul.f32 0.0, %v47_v13  ;;  %v28_v18 = vld [vmem:[%s688_s0 + $0x70] sm:$0xff] }
  0x17   :  { %360 = vmatprep.subr.mxu1 %v245_v22  ;;  %v242_v26 = vsel %vm114_vm10, %v50_v5, %v178_v20  ;;  %vm113_vm13 = vcmp.gt.f32.partialorder %v49_v16, 0.0  ;;  %v177_v27 = vmul.f32 0.0, %v49_v16  ;;  %vm110_vm14 = vcmp.gt.f32.partialorder %v46_v17, 0.0  ;;  %v23_v22 = vld [vmem:[%s688_s0 + $0x48] sm:$0xff] }
  0x18   :  { %290 = vmatpush1.msra.mxu0 %v242_v26  ;;  %v244_v30 = vsel %vm116_vm11, %v52_v9, %v180_v23  ;;  %v239_v31 = vsel %vm111_vm12, %v47_v13, %v175_v24  ;;  %v174_v32 = vmul.f32 0.0, %v46_v17  ;;  %vm112_vm15 = vcmp.gt.f32.partialorder %v48_v21, 0.0  ;;  %v29_v13 = vld [vmem:[%s688_s0 + $0x78] sm:$0xff]  ;;  %v22_v26 = vld [vmem:[%s688_s0 + $0x40] sm:$0xff] }
  0x19   :  { %361 = vmatpush1.msra.mxu1 %v244_v30  ;;  %291 = vmatprep.subr.mxu0 %v239_v31  ;;  %v241_v35 = vsel %vm113_vm13, %v49_v16, %v177_v27  ;;  %v176_v36 = vmul.f32 0.0, %v48_v21  ;;  %vm107_vm0 = vcmp.gt.f32.partialorder %v43_v25, 0.0  ;;  %v171_v37 = vmul.f32 0.0, %v43_v25  ;;  %v24_v30 = vld [vmem:[%s688_s0 + $0x50] sm:$0xff] }
  0x1a   :  { %362 = vmatprep.subr.mxu1 %v241_v35  ;;  %v238_v39 = vsel %vm110_vm14, %v46_v17, %v174_v32  ;;  %vm109_vm1 = vcmp.gt.f32.partialorder %v45_v28, 0.0  ;;  %v173_v40 = vmul.f32 0.0, %v45_v28  ;;  %vm106_vm2 = vcmp.gt.f32.partialorder %v42_v29, 0.0 }
  0x1b   :  { %292 = vmatpush1.msra.mxu0 %v238_v39  ;;  %v240_v43 = vsel %vm112_vm15, %v48_v21, %v176_v36  ;;  %v235_v44 = vsel %vm107_vm0, %v43_v25, %v171_v37  ;;  %v170_v45 = vmul.f32 0.0, %v42_v29  ;;  %vm108_vm3 = vcmp.gt.f32.partialorder %v44_v33, 0.0  ;;  %v25_v25 = vld [vmem:[%s688_s0 + $0x58] sm:$0xff] }
  0x1c   :  { %363 = vmatpush1.msra.mxu1 %v240_v43  ;;  %293 = vmatprep.subr.mxu0 %v235_v44  ;;  %v237_v47 = vsel %vm109_vm1, %v45_v28, %v173_v40  ;;  %v172_v48 = vmul.f32 0.0, %v44_v33  ;;  %vm103_vm4 = vcmp.gt.f32.partialorder %v39_v38, 0.0  ;;  %v167_v49 = vmul.f32 0.0, %v39_v38  ;;  %v21_v37 = vld [vmem:[%s688_s0 + $0x38] sm:$0xff] }
  0x1d   :  { %364 = vmatprep.subr.mxu1 %v237_v47  ;;  %v234_v51 = vsel %vm106_vm2, %v42_v29, %v170_v45  ;;  %vm105_vm5 = vcmp.gt.f32.partialorder %v41_v41, 0.0  ;;  %v169_v52 = vmul.f32 0.0, %v41_v41  ;;  %vm102_vm6 = vcmp.gt.f32.partialorder %v38_v42, 0.0 }
  0x1e   :  { %294 = vmatpush1.msra.mxu0 %v234_v51  ;;  %v236_v55 = vsel %vm108_vm3, %v44_v33, %v172_v48  ;;  %v231_v56 = vsel %vm103_vm4, %v39_v38, %v167_v49  ;;  %v166_v57 = vmul.f32 0.0, %v38_v42  ;;  %vm104_vm7 = vcmp.gt.f32.partialorder %v40_v46, 0.0  ;;  %v18_v38 = vld [vmem:[%s688_s0 + $0x20] sm:$0xff]  ;;  %v17_v49 = vld [vmem:[%s688_s0 + $0x18] sm:$0xff] }
  0x1f   :  { %365 = vmatpush1.msra.mxu1 %v236_v55  ;;  %295 = vmatprep.subr.mxu0 %v231_v56  ;;  %v233_v59 = vsel %vm105_vm5, %v41_v41, %v169_v52  ;;  %v168_v60 = vmul.f32 0.0, %v40_v46  ;;  %vm99_vm8 = vcmp.gt.f32.partialorder %v35_v50, 0.0  ;;  %v163_v61 = vmul.f32 0.0, %v35_v50 }
  0x20   :  { %366 = vmatprep.subr.mxu1 %v233_v59  ;;  %v230_v63 = vsel %vm102_vm6, %v38_v42, %v166_v57  ;;  %vm101_vm9 = vcmp.gt.f32.partialorder %v37_v53, 0.0  ;;  %v165_v0 = vmul.f32 0.0, %v37_v53  ;;  %vm98_vm10 = vcmp.gt.f32.partialorder %v34_v54, 0.0  ;;  %v20_v42 = vld [vmem:[%s688_s0 + $0x30] sm:$0xff] }
  0x21   :  { %296 = vmatpush1.msra.mxu0 %v230_v63  ;;  %v232_v3 = vsel %vm104_vm7, %v40_v46, %v168_v60  ;;  %v227_v4 = vsel %vm99_vm8, %v35_v50, %v163_v61  ;;  %v162_v5 = vmul.f32 0.0, %v34_v54  ;;  %vm100_vm11 = vcmp.gt.f32.partialorder %v36_v58, 0.0  ;;  %v15_v46 = vld [vmem:[%s688_s0 + $0x8] sm:$0xff]  ;;  %v14_v50 = vld [vmem:[%s688_s0] sm:$0xff] }
  0x22   :  { %367 = vmatpush1.msra.mxu1 %v232_v3  ;;  %297 = vmatprep.subr.mxu0 %v227_v4  ;;  %v229_v7 = vsel %vm101_vm9, %v37_v53, %v165_v0  ;;  %v164_v8 = vmul.f32 0.0, %v36_v58  ;;  %vm95_vm12 = vcmp.gt.f32.partialorder %v31_v62, 0.0  ;;  %v159_v9 = vmul.f32 0.0, %v31_v62 }
  0x23   :  { %368 = vmatprep.subr.mxu1 %v229_v7  ;;  %v226_v11 = vsel %vm98_vm10, %v34_v54, %v162_v5  ;;  %vm97_vm13 = vcmp.gt.f32.partialorder %v33_v1, 0.0  ;;  %v161_v12 = vmul.f32 0.0, %v33_v1  ;;  %vm94_vm14 = vcmp.gt.f32.partialorder %v30_v2, 0.0  ;;  %v16_v54 = vld [vmem:[%s688_s0 + $0x10] sm:$0xff] }
  0x24   :  { %298 = vmatpush1.msra.mxu0 %v226_v11  ;;  %v228_v15 = vsel %vm100_vm11, %v36_v58, %v164_v8  ;;  %v223_v16 = vsel %vm95_vm12, %v31_v62, %v159_v9  ;;  %v158_v17 = vmul.f32 0.0, %v30_v2  ;;  %vm96_vm15 = vcmp.gt.f32.partialorder %v32_v6, 0.0 }
  0x25   :  { %369 = vmatpush1.msra.mxu1 %v228_v15  ;;  %299 = vmatprep.subr.mxu0 %v223_v16  ;;  %v225_v19 = vsel %vm97_vm13, %v33_v1, %v161_v12  ;;  %v160_v20 = vmul.f32 0.0, %v32_v6  ;;  %vm91_vm0 = vcmp.gt.f32.partialorder %v27_v10, 0.0  ;;  %v155_v21 = vmul.f32 0.0, %v27_v10  ;;  %v270_v1 = vld [vmem:[%s690_s1] sm:$0xf] }
  0x26   :  { %370 = vmatprep.subr.mxu1 %v225_v19  ;;  %v222_v23 = vsel %vm94_vm14, %v30_v2, %v158_v17  ;;  %vm93_vm1 = vcmp.gt.f32.partialorder %v29_v13, 0.0  ;;  %v157_v24 = vmul.f32 0.0, %v29_v13  ;;  %vm90_vm2 = vcmp.gt.f32.partialorder %v26_v14, 0.0 }
  0x27   :  { %300 = vmatpush1.msra.mxu0 %v222_v23  ;;  %v224_v27 = vsel %vm96_vm15, %v32_v6, %v160_v20  ;;  %v219_v28 = vsel %vm91_vm0, %v27_v10, %v155_v21  ;;  %v154_v29 = vmul.f32 0.0, %v26_v14  ;;  %vm92_vm3 = vcmp.gt.f32.partialorder %v28_v18, 0.0 }
  0x28   :  { %371 = vmatpush1.msra.mxu1 %v224_v27  ;;  %301 = vmatprep.subr.mxu0 %v219_v28  ;;  %v221_v31 = vsel %vm93_vm1, %v29_v13, %v157_v24  ;;  %v156_v32 = vmul.f32 0.0, %v28_v18  ;;  %vm87_vm4 = vcmp.gt.f32.partialorder %v23_v22, 0.0  ;;  %v151_v33 = vmul.f32 0.0, %v23_v22 }
  0x29   :  { %372 = vmatprep.subr.mxu1 %v221_v31  ;;  %v218_v35 = vsel %vm90_vm2, %v26_v14, %v154_v29  ;;  %vm89_vm5 = vcmp.gt.f32.partialorder %v25_v25, 0.0  ;;  %v153_v36 = vmul.f32 0.0, %v25_v25  ;;  %vm86_vm6 = vcmp.gt.f32.partialorder %v22_v26, 0.0 }
  0x2a   :  { %302 = vmatpush1.msra.mxu0 %v218_v35  ;;  %v220_v39 = vsel %vm92_vm3, %v28_v18, %v156_v32  ;;  %v215_v40 = vsel %vm87_vm4, %v23_v22, %v151_v33  ;;  %v150_v41 = vmul.f32 0.0, %v22_v26  ;;  %vm88_vm7 = vcmp.gt.f32.partialorder %v24_v30, 0.0 }
  0x2b   :  { %373 = vmatpush1.msra.mxu1 %v220_v39  ;;  %303 = vmatprep.subr.mxu0 %v215_v40  ;;  %v217_v43 = vsel %vm89_vm5, %v25_v25, %v153_v36  ;;  %v152_v44 = vmul.f32 0.0, %v24_v30  ;;  %vm83_vm8 = vcmp.gt.f32.partialorder %v19_v34, 0.0  ;;  %v147_v45 = vmul.f32 0.0, %v19_v34 }
  0x2c   :  { %374 = vmatprep.subr.mxu1 %v217_v43  ;;  %v214_v47 = vsel %vm86_vm6, %v22_v26, %v150_v41  ;;  %vm85_vm9 = vcmp.gt.f32.partialorder %v21_v37, 0.0  ;;  %v149_v48 = vmul.f32 0.0, %v21_v37  ;;  %vm82_vm10 = vcmp.gt.f32.partialorder %v18_v38, 0.0 }
  0x2d   :  { %304 = vmatpush1.msra.mxu0 %v214_v47  ;;  %v216_v51 = vsel %vm88_vm7, %v24_v30, %v152_v44  ;;  %v211_v52 = vsel %vm83_vm8, %v19_v34, %v147_v45  ;;  %v146_v53 = vmul.f32 0.0, %v18_v38  ;;  %vm84_vm11 = vcmp.gt.f32.partialorder %v20_v42, 0.0 }
  0x2e   :  { %375 = vmatpush1.msra.mxu1 %v216_v51  ;;  %305 = vmatprep.subr.mxu0 %v211_v52  ;;  %v213_v55 = vsel %vm85_vm9, %v21_v37, %v149_v48  ;;  %v148_v56 = vmul.f32 0.0, %v20_v42  ;;  %vm79_vm12 = vcmp.gt.f32.partialorder %v15_v46, 0.0  ;;  %v143_v57 = vmul.f32 0.0, %v15_v46 }
  0x2f   :  { %376 = vmatprep.subr.mxu1 %v213_v55  ;;  %v210_v58 = vsel %vm82_vm10, %v18_v38, %v146_v53  ;;  %vm81_vm13 = vcmp.gt.f32.partialorder %v17_v49, 0.0  ;;  %v145_v59 = vmul.f32 0.0, %v17_v49  ;;  %vm78_vm14 = vcmp.gt.f32.partialorder %v14_v50, 0.0 }
  0x30   :  { %306 = vmatpush1.msra.mxu0 %v210_v58  ;;  %v212_v60 = vsel %vm84_vm11, %v20_v42, %v148_v56  ;;  %v207_v61 = vsel %vm79_vm12, %v15_v46, %v143_v57  ;;  %v142_v62 = vmul.f32 0.0, %v14_v50  ;;  %vm80_vm15 = vcmp.gt.f32.partialorder %v16_v54, 0.0 }
  0x31   :  { %377 = vmatpush1.msra.mxu1 %v212_v60  ;;  %307 = vmatprep.subr.mxu0 %v207_v61  ;;  %v209_v63 = vsel %vm81_vm13, %v17_v49, %v145_v59  ;;  %v144_v0 = vmul.f32 0.0, %v16_v54 }
  0x32   :  { %378 = vmatprep.subr.mxu1 %v209_v63  ;;  %v206_v2 = vsel %vm78_vm14, %v14_v50, %v142_v62 }
  0x33   :  { %308 = vmatpush1.msra.mxu0 %v206_v2  ;;  %v208_v3 = vsel %vm80_vm15, %v16_v54, %v144_v0 }
  0x34   :  { %379 = vmatpush1.msra.mxu1 %v208_v3  ;;  %342 = vmatmul.mubr.f32.vlgmr.msra.gmra.mxu0 %v270_v1 }
  0x35   :  { %413 = vmatmul.mubr.f32.vlgmr.msra.gmra.mxu1 %v270_v1 }
  0x8a   :  { %v275_v4 = vpop.permute.xlu0 %274 }
  0xf4   :  { %v343_v5 = vpop.f32.mrf.mxu0 }
  0xf5   :  { %v414_v6 = vpop.f32.mrf.mxu1  ;;  %v344_v8 = vadd.f32 %v343_v5, %v275_v4 }
  0xf6   :  { %v345_v7 = vpop.f32.mrf.mxu0  ;;  %v415_v11 = vadd.f32 %v414_v6, %v275_v4 }
  0xf7   :  { %v346_v9 = vadd.f32 %v345_v7, %v275_v4  ;;  %v416_v10 = vpop.f32.mrf.mxu1 }
  0xf8   :  { %v417_v12 = vadd.f32 %v416_v10, %v275_v4 }
  0xf9   :  { %v423_v13 = vcombine.low %v344_v8, %v346_v9 }
  0xfa   :  { %v424_v14 = vcombine.low %v415_v11, %v417_v12 }
  0xfb   :  { %427 = vst [vmem:[%s691_s3] sm:$0xff] %v423_v13 }
  0xfc   :  { %428 = vst [vmem:[%s691_s3 + $0x8] sm:$0xff] %v424_v14 }

</bundles_post_ra>
